<compile_context>
chip_gen: v5e
topology: v5e:2x2
jax: 0.10.0
libtpu: 0.0.40
codegen_flags: <defaults>
</compile_context>

<pallas_src>
import functools

import jax
import jax.numpy as jnp
from jax.experimental import pallas as pl
from jax.experimental.pallas import tpu as pltpu


def _ce_label_smoothing_kernel(pred_ref, true_ref, out_ref, *, eps: float,
                               inv_c: float, num_classes: int,
                               total_rows: int, block_rows: int):
    """One grid step: bb rows x full C. Writes per-row loss to a (bb,128) block."""
    xf = pred_ref[...].astype(jnp.float32)              # (bb, C) logits (f32)
    tf = true_ref[...].astype(jnp.float32)              # (bb, C) target probs

    # Numerically-stable log-sum-exp along the class (lane) axis. The block
    # spans the full C dimension; (x - m) only exists inside this fused
    # reduction chain (no standalone (bb, C) temporary is kept live).
    m = jnp.max(xf, axis=1, keepdims=True)                               # (bb,1)
    lse = jnp.log(jnp.sum(jnp.exp(xf - m), axis=1, keepdims=True))       # (bb,1)

    # Reductions on the raw tiles; shifted sums derived algebraically.
    sum_t = jnp.sum(tf, axis=1, keepdims=True)                           # (bb,1)
    sum_tx = jnp.sum(tf * xf, axis=1, keepdims=True)                     # (bb,1)
    sum_tz = sum_tx - m * sum_t                                          # = sum(t*(x-m))

    one_m_eps = 1.0 - eps
    if eps > 0.0:
        sum_x = jnp.sum(xf, axis=1, keepdims=True)                       # (bb,1)
        sum_z = sum_x - float(num_classes) * m                           # = sum(x-m)
        loss_row = (lse * (one_m_eps * sum_t + eps)
                    - (one_m_eps * sum_tz + eps * inv_c * sum_z))        # (bb,1)
    else:
        loss_row = lse * sum_t - sum_tz                                  # (bb,1)

    # Zero rows past the true batch extent (padded last block) so the
    # intermediate output never carries NaN/Inf from unspecified VMEM padding.
    row_idx = (pl.program_id(0) * block_rows
               + jax.lax.broadcasted_iota(jnp.int32, loss_row.shape, 0))
    loss_row = jnp.where(row_idx < total_rows, loss_row, 0.0)

    # Lane-dense write (unmasked vector stores); wrapper reads lane 0.
    out_ref[...] = jnp.broadcast_to(loss_row, out_ref.shape)


def _vmem_limit_bytes() -> int:
    """Per-TensorCore VMEM limit to request, with headroom for the compiler."""
    cap = 64 * 1024 * 1024           # conservative fallback = v7x per-TC VMEM
    try:
        info = pltpu.get_tpu_info()
        c = getattr(info, "vmem_capacity_bytes", None)
        if c:
            cap = int(c)
    except Exception:
        pass
    return min(cap - (4 << 20), 96 << 20)


def _pick_block_rows(B: int, C: int, pred_dtype, true_dtype,
                     vmem_limit: int) -> int:
    """Rows per grid step: multiple of 8 (or full B if B <= 8).

    Budgets the double-buffered input tiles plus the f32 working copies /
    fused-op temporaries against ~75% of the requested VMEM limit, and caps
    bb so the grid keeps >= 2 steps (v7x has 2 TensorCores to feed).
    """
    if B <= 8:
        return B
    pd, td = jnp.dtype(pred_dtype), jnp.dtype(true_dtype)
    bytes_in = pd.itemsize + td.itemsize            # both inputs, per element
    f32_work = 8 if (pd == jnp.float32 and td == jnp.float32) else 16
    per_row = C * (2 * bytes_in + f32_work)         # 2 pipeline bufs + f32 work
    budget = int(vmem_limit * 0.75)
    bb = max(8, (budget // max(per_row, 1)) // 8 * 8)
    # Keep at least 2 grid steps so both v7x TensorCores get work.
    half = ((B + 1) // 2 + 7) // 8 * 8
    bb = min(bb, max(8, half))
    return bb


def custom_loss(y_pred: jax.Array, y_true: jax.Array,
                label_smoothing: float = 0.1,
                block_rows: int | None = None) -> jax.Array:
    """Pallas implementation of CustomLoss.forward. Returns a scalar f32 loss."""
    # Same reshape the PyTorch module performs.
    if y_pred.ndim == 4:
        b, _, h, w = y_pred.shape
        y_pred = y_pred.reshape(b, h * w)
    if y_true.ndim == 4:
        b, _, h, w = y_true.shape
        y_true = y_true.reshape(b, h * w)

    B, C = y_pred.shape
    eps = float(label_smoothing) if label_smoothing > 0 else 0.0

    vmem_limit = _vmem_limit_bytes()
    bb = (block_rows if block_rows is not None
          else _pick_block_rows(B, C, y_pred.dtype, y_true.dtype, vmem_limit))
    nb = pl.cdiv(B, bb)

    kernel = functools.partial(_ce_label_smoothing_kernel,
                               eps=eps, inv_c=1.0 / C, num_classes=C,
                               total_rows=B, block_rows=bb)

    in_bytes = (B * C * jnp.dtype(y_pred.dtype).itemsize
                + B * C * jnp.dtype(y_true.dtype).itemsize)
    cost = pl.CostEstimate(
        flops=8 * B * C,
        transcendentals=B * C,
        bytes_accessed=in_bytes + nb * bb * 128 * 4,
    )

    row_losses = pl.pallas_call(
        kernel,
        out_shape=jax.ShapeDtypeStruct((nb * bb, 128), jnp.float32),
        grid_spec=pltpu.PrefetchScalarGridSpec(
            num_scalar_prefetch=0,
            grid=(nb,),
            in_specs=[
                pl.BlockSpec((bb, C), lambda i: (i, 0)),
                pl.BlockSpec((bb, C), lambda i: (i, 0)),
            ],
            out_specs=pl.BlockSpec((bb, 128), lambda i: (i, 0)),
        ),
        compiler_params=pltpu.CompilerParams(
            dimension_semantics=("parallel",),
            vmem_limit_bytes=vmem_limit),
        cost_estimate=cost,
    )(y_pred, y_true)

    # Padded rows were masked to 0 in-kernel; slice is belt-and-braces.
    return jnp.sum(row_losses[:B, 0]) / B


def _reference_loss(y_pred, y_true, label_smoothing=0.1):
    """Pure-JAX reference mirroring torch.nn.CrossEntropyLoss(label_smoothing)."""
    B, _, H, W = y_pred.shape
    x = y_pred.reshape(B, H * W).astype(jnp.float32)
    t = y_true.reshape(B, H * W).astype(jnp.float32)
    C = x.shape[1]
    logp = jax.nn.log_softmax(x, axis=1)
    smoothed = t * (1.0 - label_smoothing) + label_smoothing / C
    return jnp.mean(-jnp.sum(smoothed * logp, axis=1))


if __name__ == "__main__":
    key = jax.random.PRNGKey(0)
    k1, k2, k3, k4 = jax.random.split(key, 4)

    label_smoothing = 0.1

    # Case 1: tiny batch (B < 8) -> single block equal to the full arrays.
    B1, H1, W1 = 2, 16, 16
    y_pred1 = jax.random.normal(k1, (B1, 1, H1, W1), dtype=jnp.float32)
    y_true1 = jax.nn.sigmoid(jax.random.normal(k2, (B1, 1, H1, W1),
                                               dtype=jnp.float32))
    loss1 = jax.block_until_ready(custom_loss(y_pred1, y_true1, label_smoothing))
    ref1 = jax.block_until_ready(_reference_loss(y_pred1, y_true1, label_smoothing))
    assert jnp.allclose(loss1, ref1, rtol=1e-5, atol=1e-5), (loss1, ref1)

    # Case 2: multi-step pipelined grid with a padded, in-kernel-masked last
    # block (B = 20 is not a multiple of the forced 8-row tile).
    B2, H2, W2 = 20, 16, 16
    y_pred2 = jax.random.normal(k3, (B2, 1, H2, W2), dtype=jnp.float32)
    y_true2 = jax.nn.sigmoid(jax.random.normal(k4, (B2, 1, H2, W2),
                                               dtype=jnp.float32))
    loss2 = jax.block_until_ready(
        custom_loss(y_pred2, y_true2, label_smoothing, block_rows=8))
    ref2 = jax.block_until_ready(_reference_loss(y_pred2, y_true2, label_smoothing))
    assert jnp.allclose(loss2, ref2, rtol=1e-5, atol=1e-5), (loss2, ref2)

    # Case 3: eps == 0 specialization + auto block-row selection (nb >= 2).
    loss3 = jax.block_until_ready(custom_loss(y_pred2, y_true2, 0.0))
    ref3 = jax.block_until_ready(_reference_loss(y_pred2, y_true2, 0.0))
    assert jnp.allclose(loss3, ref3, rtol=1e-5, atol=1e-5), (loss3, ref3)

    print("KERNEL_OK")
</pallas_src>

<mosaic_0001>
module attributes {stable_mosaic.version = 11 : i64} {
  func.func @_ce_label_smoothing_kernel(%arg0: i32, %arg1: memref<2x256xf32, #tpu.memory_space<vmem>>, %arg2: memref<2x256xf32, #tpu.memory_space<vmem>>, %arg3: memref<2x128xf32, #tpu.memory_space<vmem>>) attributes {dimension_semantics = [#tpu.dimension_semantics<parallel>], iteration_bounds = array<i64: 1>, scalar_prefetch = 0 : i64, scratch_operands = 0 : i64, tpu.core_type = #tpu.core_type<tc>, window_params = [{transform_indices = @transform_0, window_bounds = array<i64: 2, 256>}, {transform_indices = @transform_1, window_bounds = array<i64: 2, 256>}, {transform_indices = @transform_2, window_bounds = array<i64: 2, 128>}]} {
    %c0 = arith.constant 0 : index
    %c0_0 = arith.constant 0 : index
    %0 = vector.load %arg1[%c0, %c0_0] : memref<2x256xf32, #tpu.memory_space<vmem>>, vector<2x256xf32>
    %c0_1 = arith.constant 0 : index
    %c0_2 = arith.constant 0 : index
    %1 = vector.load %arg2[%c0_1, %c0_2] : memref<2x256xf32, #tpu.memory_space<vmem>>, vector<2x256xf32>
    %cst = arith.constant dense<0xFF800000> : vector<2xf32>
    %2 = vector.multi_reduction <maximumf>, %0, %cst [1] : vector<2x256xf32> to vector<2xf32>
    %3 = vector.shape_cast %2 : vector<2xf32> to vector<2x1xf32>
    %4 = vector.broadcast %3 : vector<2x1xf32> to vector<2x256xf32>
    %5 = arith.subf %0, %4 : vector<2x256xf32>
    %6 = math.exp %5 : vector<2x256xf32>
    %cst_3 = arith.constant dense<0.000000e+00> : vector<2xf32>
    %7 = vector.multi_reduction <add>, %6, %cst_3 [1] : vector<2x256xf32> to vector<2xf32>
    %8 = vector.shape_cast %7 : vector<2xf32> to vector<2x1xf32>
    %9 = math.log %8 : vector<2x1xf32>
    %cst_4 = arith.constant dense<0.000000e+00> : vector<2xf32>
    %10 = vector.multi_reduction <add>, %1, %cst_4 [1] : vector<2x256xf32> to vector<2xf32>
    %11 = vector.shape_cast %10 : vector<2xf32> to vector<2x1xf32>
    %12 = arith.mulf %1, %0 : vector<2x256xf32>
    %cst_5 = arith.constant dense<0.000000e+00> : vector<2xf32>
    %13 = vector.multi_reduction <add>, %12, %cst_5 [1] : vector<2x256xf32> to vector<2xf32>
    %14 = vector.shape_cast %13 : vector<2xf32> to vector<2x1xf32>
    %15 = arith.mulf %3, %11 : vector<2x1xf32>
    %16 = arith.subf %14, %15 : vector<2x1xf32>
    %cst_6 = arith.constant dense<0.000000e+00> : vector<2xf32>
    %17 = vector.multi_reduction <add>, %0, %cst_6 [1] : vector<2x256xf32> to vector<2xf32>
    %18 = vector.shape_cast %17 : vector<2xf32> to vector<2x1xf32>
    %cst_7 = arith.constant 2.560000e+02 : f32
    %19 = vector.broadcast %cst_7 : f32 to vector<2x1xf32>
    %20 = arith.mulf %19, %3 : vector<2x1xf32>
    %21 = arith.subf %18, %20 : vector<2x1xf32>
    %cst_8 = arith.constant 0.899999976 : f32
    %22 = vector.broadcast %cst_8 : f32 to vector<2x1xf32>
    %23 = arith.mulf %22, %11 : vector<2x1xf32>
    %cst_9 = arith.constant 1.000000e-01 : f32
    %24 = vector.broadcast %cst_9 : f32 to vector<2x1xf32>
    %25 = arith.addf %23, %24 : vector<2x1xf32>
    %26 = arith.mulf %9, %25 : vector<2x1xf32>
    %cst_10 = arith.constant 0.899999976 : f32
    %27 = vector.broadcast %cst_10 : f32 to vector<2x1xf32>
    %28 = arith.mulf %27, %16 : vector<2x1xf32>
    %cst_11 = arith.constant 3.906250e-04 : f32
    %29 = vector.broadcast %cst_11 : f32 to vector<2x1xf32>
    %30 = arith.mulf %29, %21 : vector<2x1xf32>
    %31 = arith.addf %28, %30 : vector<2x1xf32>
    %32 = arith.subf %26, %31 : vector<2x1xf32>
    %c2_i32 = arith.constant 2 : i32
    %33 = arith.muli %arg0, %c2_i32 : i32
    %34 = tpu.iota {dimensions = array<i32: 0>} : vector<2x1xi32>
    %35 = vector.broadcast %33 : i32 to vector<2x1xi32>
    %36 = arith.addi %35, %34 : vector<2x1xi32>
    %c2_i32_12 = arith.constant 2 : i32
    %37 = vector.broadcast %c2_i32_12 : i32 to vector<2x1xi32>
    %38 = arith.cmpi slt, %36, %37 : vector<2x1xi32>
    %cst_13 = arith.constant 0.000000e+00 : f32
    %39 = vector.broadcast %cst_13 : f32 to vector<2x1xf32>
    %40 = arith.select %38, %32, %39 : vector<2x1xi1>, vector<2x1xf32>
    %41 = vector.shape_cast %40 : vector<2x1xf32> to vector<2x1xf32>
    %42 = vector.broadcast %41 : vector<2x1xf32> to vector<2x128xf32>
    %c0_14 = arith.constant 0 : index
    %c0_15 = arith.constant 0 : index
    %43 = vector.load %arg3[%c0_14, %c0_15] : memref<2x128xf32, #tpu.memory_space<vmem>>, vector<2x128xf32>
    tpu.vector_store %arg3[%c0_14, %c0_15], %42 {strides = array<i32>} : memref<2x128xf32, #tpu.memory_space<vmem>>, vector<2x128xf32>,
    return
  }
  func.func @transform_0(%arg0: i32) -> (i32, i32) {
    %c0_i32 = arith.constant 0 : i32
    %c0_i32_0 = arith.constant 0 : i32
    return %arg0, %c0_i32 : i32, i32
  }
  func.func @transform_1(%arg0: i32) -> (i32, i32) {
    %c0_i32 = arith.constant 0 : i32
    %c0_i32_0 = arith.constant 0 : i32
    return %arg0, %c0_i32 : i32, i32
  }
  func.func @transform_2(%arg0: i32) -> (i32, i32) {
    %c0_i32 = arith.constant 0 : i32
    %c0_i32_0 = arith.constant 0 : i32
    return %arg0, %c0_i32 : i32, i32
  }
}

</mosaic_0001>

<bundles_post_ra>
// kernel: tpu_custom_call.1
= control target key start
LH: loop header
LB: loop body
LE: loop exit
PB: predicated region body
PF: predicated region fallthrough
CT: control target
= control target key end

     0   :  { %7 = vsyncpa [#allocation3], 0  ;;  %s270_s0 = inlined_call_operand.hbm [shape: f32[2,256], index: 0, kind: input, shape index: {}]   ;;  %s271_s1 = inlined_call_operand.hbm [shape: f32[2,256], index: 1, kind: input, shape index: {}]   ;;  %s272_s2 = inlined_call_operand.hbm [shape: f32[2,128], index: 2, kind: output, shape index: {}]  }
   0x1   :  { %8 = vsyncpa [#allocation6], 0 }
   0x2   :  { %9 = vsyncpa [#allocation4], 0  ;;  %s15_s11 = sshll.u32 %s270_s0, 4  ;;  %s232_s12 = smov [#allocation2]   ;;  %s16_s11 = int_to_ptr.hbm [resolvable:$true] %s15_s11 }
   0x3   :  { %s17_s13 = sshll.u32 %s232_s12, 4  ;;  %s26_s16 = sshll.u32 %s271_s1, 4  ;;  %s18_s13 = int_to_ptr.vmem [resolvable:$true] %s17_s13  ;;  %s27_s16 = int_to_ptr.hbm [resolvable:$true] %s26_s16 }
   0x4   :  { %20 = dma.hbm_to_vmem [thread:$0]  %s16_s11, 64, %s18_s13, [#allocation3]  }
   0x5   :  { %s233_s17 = smov [#allocation5]  }
   0x6   :  { %s28_s18 = sshll.u32 %s233_s17, 4  ;;  %s29_s18 = int_to_ptr.vmem [resolvable:$true] %s28_s18 }
   0x7   :  { %31 = dma.hbm_to_vmem [thread:$0]  %s27_s16, 64, %s29_s18, [#allocation6]  }
   0x8   :  { %226 = dma.done.wait [#allocation3], 64  }
   0x9   :  { %227 = vsyncadd [#allocation3], 4294967232 }
   0xa   :  { %228 = dma.done.wait [#allocation6], 64  }
   0xb   :  { %229 = vsyncadd [#allocation6], 4294967232  ;;  %v40_v0 = vld [vmem:[#allocation2] sm:$0xf]  ;;  %vm48_vm0 = vcmask 1041408   ;;  %v121_v41 = vlaneseq  ;;  %s235_s0 = smov [#allocation7]  }
   0xc   :  { %43 = vst [vmem:[#allocation1] ss:$4 sm:$0xff] %v40_v0  ;;  %v234_v6 = vmov 269488144   ;;  %v41_v14 = vld [vmem:[#allocation5] sm:$0xf] }
   0xd   :  { %v56_v7 = vunpack.c.l.s4 %v234_v6  ;;  %v87_v20 = vmul.f32 %v41_v14, %v40_v0  ;;  %v122_v48 = vshrl.u32 %v121_v41, 7  ;;  %s133_s1 = sshll.u32 %s235_s0, 4  ;;  %s135_s21 = sshll.u32 %s272_s2, 4  ;;  %s134_s1 = int_to_ptr.vmem [resolvable:$true] %s133_s1  ;;  %s136_s21 = int_to_ptr.hbm [resolvable:$true] %s135_s21 }
   0xf   :  { %v57_v8 = vunpack.c.0.s8 %v56_v7  ;;  %vm125_vm1 = vcmp.lt.s32.totalorder %v122_v48, 2 }
  0x13   :  { %v44_v1 = vld.sshfl [vmem:[#allocation1] sm:$0xff pattern:$0x73625140]  ;;  %v45_v2 = vld.sshfl [vmem:[#allocation1 + $0x8] sm:$0xff pattern:$0x73625140] }
  0x14   :  { %v49_v3 = vsel %vm48_vm0, %v44_v1, -inf  ;;  %v50_v4 = vsel %vm48_vm0, %v45_v2, -inf }
  0x15   :  { %v51_v5 = vmax.f32 %v49_v3, %v50_v4 }
  0x17   :  { %52 = vmax.xlane.f32.xlu0 %v51_v5 }
  0x8a   :  { %v53_v9 = vpop.xlane.xlu0 %52 }
  0x8b   :  { %v58_v10 = vperm.slane %v53_v9, %v57_v8  ;;  %v111_v43 = vmul.f32 256.0, %v53_v9 }
  0x8d   :  { %v60_v11 = vsub.f32 %v40_v0, %v58_v10 }
  0x8f   :  { %v61_v12 = vmul.f32 1.442695, %v60_v11 }
  0x91   :  { %150 = vpow2.f32 %v61_v12 }
  0x97   :  { %v151_v13 = vpop.eup %150 }
  0x98   :  { %64 = vst [vmem:[#allocation1] ss:$4 sm:$0xff] %v151_v13 }
  0x9f   :  { %v65_v15 = vld.sshfl [vmem:[#allocation1] sm:$0xff pattern:$0x73625140]  ;;  %v66_v16 = vld.sshfl [vmem:[#allocation1 + $0x8] sm:$0xff pattern:$0x73625140] }
  0xa0   :  { %v69_v17 = vsel %vm48_vm0, %v65_v15, 0.0  ;;  %v70_v18 = vsel %vm48_vm0, %v66_v16, 0.0  ;;  %77 = vst [vmem:[#allocation1] ss:$4 sm:$0xff] %v41_v14 }
  0xa1   :  { %v71_v19 = vadd.f32 %v70_v18, %v69_v17 }
  0xa3   :  { %72 = vadd.xlane.f32.xlu0 %v71_v19 }
  0xa7   :  { %v78_v21 = vld.sshfl [vmem:[#allocation1] sm:$0xff pattern:$0x73625140]  ;;  %v79_v22 = vld.sshfl [vmem:[#allocation1 + $0x8] sm:$0xff pattern:$0x73625140] }
  0xa8   :  { %v82_v23 = vsel %vm48_vm0, %v78_v21, 0.0  ;;  %v83_v24 = vsel %vm48_vm0, %v79_v22, 0.0  ;;  %89 = vst [vmem:[#allocation1] ss:$4 sm:$0xff] %v87_v20 }
  0xa9   :  { %v84_v25 = vadd.f32 %v83_v24, %v82_v23 }
  0xab   :  { %85 = vadd.xlane.f32.xlu1 %v84_v25 }
  0xaf   :  { %v90_v26 = vld.sshfl [vmem:[#allocation1] sm:$0xff pattern:$0x73625140]  ;;  %v91_v27 = vld.sshfl [vmem:[#allocation1 + $0x8] sm:$0xff pattern:$0x73625140] }
  0xb0   :  { %v94_v28 = vsel %vm48_vm0, %v90_v26, 0.0  ;;  %v95_v29 = vsel %vm48_vm0, %v91_v27, 0.0  ;;  %101 = vst [vmem:[#allocation1] ss:$4 sm:$0xff] %v40_v0 }
  0xb1   :  { %v96_v30 = vadd.f32 %v95_v29, %v94_v28 }
  0xb3   :  { %97 = vadd.xlane.f32.xlu1 %v96_v30 }
  0xb7   :  { %v102_v31 = vld.sshfl [vmem:[#allocation1] sm:$0xff pattern:$0x73625140]  ;;  %v103_v32 = vld.sshfl [vmem:[#allocation1 + $0x8] sm:$0xff pattern:$0x73625140] }
  0xb8   :  { %v106_v33 = vsel %vm48_vm0, %v102_v31, 0.0  ;;  %v107_v34 = vsel %vm48_vm0, %v103_v32, 0.0 }
  0xb9   :  { %v108_v35 = vadd.f32 %v107_v34, %v106_v33 }
  0xbb   :  { %109 = vadd.xlane.f32.xlu2 %v108_v35 }
 0x116   :  { %v73_v37 = vpop.xlane.xlu0 %72 }
 0x117   :  { %152 = vlog2.f32 %v73_v37 }
 0x11d   :  { %v153_v44 = vpop.eup %152 }
 0x11e   :  { %v86_v36 = vpop.xlane.xlu1 %85  ;;  %v75_v49 = vmul.f32 0.6931472, %v153_v44 }
 0x11f   :  { %v99_v39 = vmul.f32 %v86_v36, %v53_v9  ;;  %v113_v40 = vmul.f32 0.9, %v86_v36 }
 0x121   :  { %v114_v46 = vadd.f32 0.1, %v113_v40 }
 0x123   :  { %v115_v52 = vmul.f32 %v114_v46, %v75_v49 }
 0x126   :  { %v98_v38 = vpop.xlane.xlu1 %97 }
 0x127   :  { %v100_v42 = vsub.f32 %v98_v38, %v99_v39 }
 0x129   :  { %v116_v50 = vmul.f32 0.9, %v100_v42 }
 0x12e   :  { %v110_v45 = vpop.xlane.xlu2 %109 }
 0x12f   :  { %v112_v47 = vsub.f32 %v110_v45, %v111_v43 }
 0x131   :  { %v117_v51 = vmul.f32 0.000390625, %v112_v47 }
 0x133   :  { %v118_v53 = vadd.f32 %v117_v51, %v116_v50 }
 0x135   :  { %v119_v54 = vsub.f32 %v115_v52, %v118_v53 }
 0x137   :  { %v126_v55 = vsel %vm125_vm1, %v119_v54, 0.0 }
 0x138   :  { %127 = vst [vmem:[#allocation7] sm:$0x3] %v126_v55 }
 0x139   :  { %138 = dma.vmem_to_hbm [thread:$0]  %s134_s1, 32, %s136_s21, [#allocation4]  }
 0x13a   :  { %230 = dma.done.wait [#allocation4], 32  }
 0x13b   :  { %231 = vsyncadd [#allocation4], 4294967264 }
 0x13c   :  { %143 = vsyncpa [#allocation3], 1 }
 0x13d   :  { %144 = vsyncpa [#allocation6], 1 }
 0x13e   :  { %145 = vsyncpa [#allocation4], 1 }

</bundles_post_ra>
